<compile_context>
chip_gen: v7x
topology: tpu7x:2x2x1
jax: 0.10.0
libtpu: 0.0.40
codegen_flags: <defaults>
</compile_context>

<pallas_src>
import functools

import jax
import jax.numpy as jnp
from jax import lax
from jax.experimental import pallas as pl
from jax.experimental.pallas import tpu as pltpu


def _pick_row_tile(H, W):
    """Smallest row tile TH dividing H with TH*W a multiple of 128 (lane-dense
    output stores + more grid steps for pipelining). Falls back to the whole
    image if no such divisor exists."""
    for th in range(1, H + 1):
        if H % th == 0 and (th * W) % 128 == 0:
            return th
    return H


# --------------------------------------------------------------------------
# Kernel: one (image, row-block) step of dilated 3x3 conv (dilation=2) + BN
# --------------------------------------------------------------------------
def _dil_conv_bn_kernel(xp_ref, w_ref, scale_ref, shift_ref, o_ref, im_ref, *,
                        W, Cin, TH):
    """xp_ref   : (H+4, W+4, Cin)  zero-padded NHWC image (bf16); same block for
                                   every row-block of this image (DMA'd once).
       w_ref    : (Cout, 9*Cin)    raw conv weights, tap-major (bf16).
       scale_ref: (Cout, 1)        f32 BN scale  gamma / sqrt(var + eps).
       shift_ref: (Cout, 1)        f32 BN shift  beta - mean * scale.
       o_ref    : (Cout, TH*W)     output row block, channel-major / lane-dense.
       im_ref   : (TH*W, 9*Cin)    VMEM im2col scratch (bf16).
    """
    r = pl.program_id(1)
    row0 = pl.multiple_of(r * TH, TH)          # first output row of this block

    # Build the im2col tile once in VMEM: column chunk (3*ky+kx)*Cin holds the
    # dilation-2 tap (ky, kx) for every output pixel of this row block.
    for ky in range(3):
        rows = xp_ref[pl.ds(row0 + 2 * ky, TH), :, :]        # (TH, W+4, Cin)
        for kx in range(3):
            tap = rows[:, 2 * kx:2 * kx + W, :]              # (TH, W, Cin)
            c0 = (3 * ky + kx) * Cin
            im_ref[:, c0:c0 + Cin] = tap.reshape(TH * W, Cin)

    # Single K = 9*Cin MXU matmul with the weights as LHS: contracting the last
    # dim of both operands yields (Cout, TH*W) directly -> no epilogue transpose.
    y = lax.dot_general(w_ref[...], im_ref[...],
                        (((1,), (1,)), ((), ())),
                        preferred_element_type=jnp.float32)  # (Cout, TH*W) f32

    # Inference BatchNorm as one f32 FMA (scale kept out of the bf16 weights).
    o_ref[...] = (y * scale_ref[...] + shift_ref[...]).astype(o_ref.dtype)


# --------------------------------------------------------------------------
# Wrapper: layout prep, BN constants, pallas_call
# --------------------------------------------------------------------------
def dil_conv_forward(x_nchw, w_oihw, gamma, beta, running_mean, running_var,
                     *, eps=1e-5, compute_dtype=jnp.bfloat16):
    """dil_conv.forward: BatchNorm2d(Conv2d(x, k=3, dilation=2, pad=2, bias=False)),
    BatchNorm in inference mode (running statistics)."""
    N, Cin, H, W = x_nchw.shape
    Cout = w_oihw.shape[0]

    TH = _pick_row_tile(H, W)
    NR = H // TH

    # Inference-mode BN constants, applied in f32 in the kernel epilogue.
    scale = (gamma / jnp.sqrt(running_var + eps)).astype(jnp.float32)
    shift = (beta - running_mean * scale).astype(jnp.float32)

    # Raw weights, tap-major: w2[co, (3*ky + kx)*Cin + ci] = w[co, ci, ky, kx].
    w2 = (jnp.transpose(w_oihw, (0, 2, 3, 1))
          .reshape(Cout, 9 * Cin).astype(compute_dtype))

    # NHWC, zero-padded by 2 on each spatial side (same-size dilated conv), bf16.
    # TODO(synk): at production shapes, accept NHWC upstream and replace this pad
    # with an in-kernel zeroed VMEM scratch + manual halo DMA (memory_space=pl.ANY)
    # to kill the extra HBM round trip; for small Cin, interleave channels into
    # lanes ((W+4)*Cin) — deployed Cin>=128 already makes NHWC lane-dense.
    xpad = jnp.pad(jnp.transpose(x_nchw, (0, 2, 3, 1)),
                   ((0, 0), (2, 2), (2, 2), (0, 0))).astype(compute_dtype)

    # VMEM budget derived from the actual (double-buffered) blocks with large
    # headroom for relayout temps; capped below v7x's 64 MiB physical VMEM
    # (v5e/v6e have 128 MiB, so this is always safe).
    blk_in = (H + 4) * (W + 4) * Cin * 2
    blk_w = Cout * 9 * Cin * 2
    blk_out = Cout * TH * W * 4
    blk_im = TH * W * 9 * Cin * 2
    need = 2 * (blk_in + blk_w + blk_out + 2 * Cout * 4) + blk_im
    vmem_limit = int(min(max(16 * need, 16 << 20), 48 << 20))

    out = pl.pallas_call(
        functools.partial(_dil_conv_bn_kernel, W=W, Cin=Cin, TH=TH),
        out_shape=jax.ShapeDtypeStruct((N, Cout, H * W), jnp.float32),
        grid=(N, NR),
        in_specs=[
            # Whole padded image; block index constant in r -> fetched once per n.
            pl.BlockSpec((None, H + 4, W + 4, Cin), lambda n, r: (n, 0, 0, 0)),
            pl.BlockSpec((Cout, 9 * Cin), lambda n, r: (0, 0)),
            pl.BlockSpec((Cout, 1), lambda n, r: (0, 0)),
            pl.BlockSpec((Cout, 1), lambda n, r: (0, 0)),
        ],
        out_specs=pl.BlockSpec((None, Cout, TH * W), lambda n, r: (n, 0, r)),
        scratch_shapes=[pltpu.VMEM((TH * W, 9 * Cin), compute_dtype)],
        compiler_params=pltpu.CompilerParams(
            dimension_semantics=("parallel", "arbitrary"),
            vmem_limit_bytes=vmem_limit),
    )(xpad, w2, scale.reshape(Cout, 1), shift.reshape(Cout, 1))

    # Output is already channel-major: the NCHW reshape is free (no transpose).
    return out.reshape(N, Cout, H, W)


# --------------------------------------------------------------------------
# Pure-f32 reference (no bf16 casts) for accuracy checking
# --------------------------------------------------------------------------
def dil_conv_reference(x_nchw, w_oihw, gamma, beta, running_mean, running_var,
                       *, eps=1e-5):
    y = lax.conv_general_dilated(
        x_nchw.astype(jnp.float32), w_oihw.astype(jnp.float32),
        window_strides=(1, 1), padding=((2, 2), (2, 2)),
        rhs_dilation=(2, 2), dimension_numbers=("NCHW", "OIHW", "NCHW"))
    scale = gamma / jnp.sqrt(running_var + eps)
    shift = beta - running_mean * scale
    return y * scale[None, :, None, None] + shift[None, :, None, None]


# --------------------------------------------------------------------------
if __name__ == "__main__":
    key = jax.random.PRNGKey(0)
    k_x, k_w, k_g, k_b, k_m, k_v = jax.random.split(key, 6)

    # Small shapes; N=4 so the (batch, row-block) grid gives 8 pipeline steps
    # (>= 4 per TensorCore after v7x megacore sharding of the batch axis).
    N, Cin, H, W = 4, 8, 16, 16
    Cout = 16

    x = jax.random.normal(k_x, (N, Cin, H, W), jnp.float32)
    w = 0.1 * jax.random.normal(k_w, (Cout, Cin, 3, 3), jnp.float32)
    gamma = 1.0 + 0.1 * jax.random.normal(k_g, (Cout,), jnp.float32)
    beta = 0.1 * jax.random.normal(k_b, (Cout,), jnp.float32)
    running_mean = 0.1 * jax.random.normal(k_m, (Cout,), jnp.float32)
    running_var = 1.0 + jnp.abs(jax.random.normal(k_v, (Cout,), jnp.float32))

    fwd = jax.jit(dil_conv_forward)
    out = jax.block_until_ready(fwd(x, w, gamma, beta, running_mean, running_var))

    assert out.shape == (N, Cout, H, W)
    assert bool(jnp.all(jnp.isfinite(out)))

    ref = dil_conv_reference(x, w, gamma, beta, running_mean, running_var)
    err = float(jnp.max(jnp.abs(out - ref)))
    # bf16 operand rounding vs. a pure-f32 reference (f32 MXU accumulation).
    assert err < 5e-2, f"max abs error {err}"

    print("KERNEL_OK")
</pallas_src>

<mosaic_0001>
module attributes {stable_mosaic.version = 11 : i64} {
  func.func @_dil_conv_bn_kernel(%arg0: i32, %arg1: i32, %arg2: memref<1x20x20x8xbf16, #tpu.memory_space<vmem>>, %arg3: memref<16x72xbf16, #tpu.memory_space<vmem>>, %arg4: memref<16x1xf32, #tpu.memory_space<vmem>>, %arg5: memref<16x1xf32, #tpu.memory_space<vmem>>, %arg6: memref<1x16x128xf32, #tpu.memory_space<vmem>>, %arg7: memref<128x72xbf16, #tpu.memory_space<vmem>>) attributes {dimension_semantics = [#tpu.dimension_semantics<parallel>, #tpu.dimension_semantics<arbitrary>], iteration_bounds = array<i64: 4, 2>, scalar_prefetch = 0 : i64, scratch_operands = 1 : i64, tpu.core_type = #tpu.core_type<tc>, window_params = [{transform_indices = @transform_0, window_bounds = array<i64: 1, 20, 20, 8>}, {pipeline_mode = #tpu.pipeline_mode<synchronous>, transform_indices = @transform_1, window_bounds = array<i64: 16, 72>}, {pipeline_mode = #tpu.pipeline_mode<synchronous>, transform_indices = @transform_2, window_bounds = array<i64: 16, 1>}, {pipeline_mode = #tpu.pipeline_mode<synchronous>, transform_indices = @transform_3, window_bounds = array<i64: 16, 1>}, {transform_indices = @transform_4, window_bounds = array<i64: 1, 16, 128>}]} {
    %c8_i32 = arith.constant 8 : i32
    %0 = arith.muli %arg1, %c8_i32 : i32
    %1 = tpu.assume_multiple %0, 8 : i32
    %c0_i32 = arith.constant 0 : i32
    %2 = arith.addi %1, %c0_i32 : i32
    %c0 = arith.constant 0 : index
    %3 = arith.index_cast %2 : i32 to index
    %c0_0 = arith.constant 0 : index
    %c0_1 = arith.constant 0 : index
    %4 = vector.load %arg2[%c0, %3, %c0_0, %c0_1] : memref<1x20x20x8xbf16, #tpu.memory_space<vmem>>, vector<1x8x20x8xbf16>
    %5 = vector.shape_cast %4 : vector<1x8x20x8xbf16> to vector<8x20x8xbf16>
    %6 = vector.extract_strided_slice %5 {offsets = [0, 0, 0], sizes = [8, 16, 8], strides = [1, 1, 1]} : vector<8x20x8xbf16> to vector<8x16x8xbf16>
    %7 = vector.shape_cast %6 : vector<8x16x8xbf16> to vector<128x8xbf16>
    %c0_2 = arith.constant 0 : index
    %c0_3 = arith.constant 0 : index
    %8 = vector.load %arg7[%c0_2, %c0_3] : memref<128x72xbf16, #tpu.memory_space<vmem>>, vector<128x8xbf16>
    tpu.vector_store %arg7[%c0_2, %c0_3], %7 {strides = array<i32>} : memref<128x72xbf16, #tpu.memory_space<vmem>>, vector<128x8xbf16>,
    %9 = vector.extract_strided_slice %5 {offsets = [0, 2, 0], sizes = [8, 16, 8], strides = [1, 1, 1]} : vector<8x20x8xbf16> to vector<8x16x8xbf16>
    %10 = vector.shape_cast %9 : vector<8x16x8xbf16> to vector<128x8xbf16>
    %c0_4 = arith.constant 0 : index
    %c8 = arith.constant 8 : index
    %11 = vector.load %arg7[%c0_4, %c8] : memref<128x72xbf16, #tpu.memory_space<vmem>>, vector<128x8xbf16>
    tpu.vector_store %arg7[%c0_4, %c8], %10 {strides = array<i32>} : memref<128x72xbf16, #tpu.memory_space<vmem>>, vector<128x8xbf16>,
    %12 = vector.extract_strided_slice %5 {offsets = [0, 4, 0], sizes = [8, 16, 8], strides = [1, 1, 1]} : vector<8x20x8xbf16> to vector<8x16x8xbf16>
    %13 = vector.shape_cast %12 : vector<8x16x8xbf16> to vector<128x8xbf16>
    %c0_5 = arith.constant 0 : index
    %c16 = arith.constant 16 : index
    %14 = vector.load %arg7[%c0_5, %c16] : memref<128x72xbf16, #tpu.memory_space<vmem>>, vector<128x8xbf16>
    tpu.vector_store %arg7[%c0_5, %c16], %13 {strides = array<i32>} : memref<128x72xbf16, #tpu.memory_space<vmem>>, vector<128x8xbf16>,
    %c2_i32 = arith.constant 2 : i32
    %15 = arith.addi %1, %c2_i32 : i32
    %c0_6 = arith.constant 0 : index
    %16 = arith.index_cast %15 : i32 to index
    %c0_7 = arith.constant 0 : index
    %c0_8 = arith.constant 0 : index
    %17 = vector.load %arg2[%c0_6, %16, %c0_7, %c0_8] : memref<1x20x20x8xbf16, #tpu.memory_space<vmem>>, vector<1x8x20x8xbf16>
    %18 = vector.shape_cast %17 : vector<1x8x20x8xbf16> to vector<8x20x8xbf16>
    %19 = vector.extract_strided_slice %18 {offsets = [0, 0, 0], sizes = [8, 16, 8], strides = [1, 1, 1]} : vector<8x20x8xbf16> to vector<8x16x8xbf16>
    %20 = vector.shape_cast %19 : vector<8x16x8xbf16> to vector<128x8xbf16>
    %c0_9 = arith.constant 0 : index
    %c24 = arith.constant 24 : index
    %21 = vector.load %arg7[%c0_9, %c24] : memref<128x72xbf16, #tpu.memory_space<vmem>>, vector<128x8xbf16>
    tpu.vector_store %arg7[%c0_9, %c24], %20 {strides = array<i32>} : memref<128x72xbf16, #tpu.memory_space<vmem>>, vector<128x8xbf16>,
    %22 = vector.extract_strided_slice %18 {offsets = [0, 2, 0], sizes = [8, 16, 8], strides = [1, 1, 1]} : vector<8x20x8xbf16> to vector<8x16x8xbf16>
    %23 = vector.shape_cast %22 : vector<8x16x8xbf16> to vector<128x8xbf16>
    %c0_10 = arith.constant 0 : index
    %c32 = arith.constant 32 : index
    %24 = vector.load %arg7[%c0_10, %c32] : memref<128x72xbf16, #tpu.memory_space<vmem>>, vector<128x8xbf16>
    tpu.vector_store %arg7[%c0_10, %c32], %23 {strides = array<i32>} : memref<128x72xbf16, #tpu.memory_space<vmem>>, vector<128x8xbf16>,
    %25 = vector.extract_strided_slice %18 {offsets = [0, 4, 0], sizes = [8, 16, 8], strides = [1, 1, 1]} : vector<8x20x8xbf16> to vector<8x16x8xbf16>
    %26 = vector.shape_cast %25 : vector<8x16x8xbf16> to vector<128x8xbf16>
    %c0_11 = arith.constant 0 : index
    %c40 = arith.constant 40 : index
    %27 = vector.load %arg7[%c0_11, %c40] : memref<128x72xbf16, #tpu.memory_space<vmem>>, vector<128x8xbf16>
    tpu.vector_store %arg7[%c0_11, %c40], %26 {strides = array<i32>} : memref<128x72xbf16, #tpu.memory_space<vmem>>, vector<128x8xbf16>,
    %c4_i32 = arith.constant 4 : i32
    %28 = arith.addi %1, %c4_i32 : i32
    %c0_12 = arith.constant 0 : index
    %29 = arith.index_cast %28 : i32 to index
    %c0_13 = arith.constant 0 : index
    %c0_14 = arith.constant 0 : index
    %30 = vector.load %arg2[%c0_12, %29, %c0_13, %c0_14] : memref<1x20x20x8xbf16, #tpu.memory_space<vmem>>, vector<1x8x20x8xbf16>
    %31 = vector.shape_cast %30 : vector<1x8x20x8xbf16> to vector<8x20x8xbf16>
    %32 = vector.extract_strided_slice %31 {offsets = [0, 0, 0], sizes = [8, 16, 8], strides = [1, 1, 1]} : vector<8x20x8xbf16> to vector<8x16x8xbf16>
    %33 = vector.shape_cast %32 : vector<8x16x8xbf16> to vector<128x8xbf16>
    %c0_15 = arith.constant 0 : index
    %c48 = arith.constant 48 : index
    %34 = vector.load %arg7[%c0_15, %c48] : memref<128x72xbf16, #tpu.memory_space<vmem>>, vector<128x8xbf16>
    tpu.vector_store %arg7[%c0_15, %c48], %33 {strides = array<i32>} : memref<128x72xbf16, #tpu.memory_space<vmem>>, vector<128x8xbf16>,
    %35 = vector.extract_strided_slice %31 {offsets = [0, 2, 0], sizes = [8, 16, 8], strides = [1, 1, 1]} : vector<8x20x8xbf16> to vector<8x16x8xbf16>
    %36 = vector.shape_cast %35 : vector<8x16x8xbf16> to vector<128x8xbf16>
    %c0_16 = arith.constant 0 : index
    %c56 = arith.constant 56 : index
    %37 = vector.load %arg7[%c0_16, %c56] : memref<128x72xbf16, #tpu.memory_space<vmem>>, vector<128x8xbf16>
    tpu.vector_store %arg7[%c0_16, %c56], %36 {strides = array<i32>} : memref<128x72xbf16, #tpu.memory_space<vmem>>, vector<128x8xbf16>,
    %38 = vector.extract_strided_slice %31 {offsets = [0, 4, 0], sizes = [8, 16, 8], strides = [1, 1, 1]} : vector<8x20x8xbf16> to vector<8x16x8xbf16>
    %39 = vector.shape_cast %38 : vector<8x16x8xbf16> to vector<128x8xbf16>
    %c0_17 = arith.constant 0 : index
    %c64 = arith.constant 64 : index
    %40 = vector.load %arg7[%c0_17, %c64] : memref<128x72xbf16, #tpu.memory_space<vmem>>, vector<128x8xbf16>
    tpu.vector_store %arg7[%c0_17, %c64], %39 {strides = array<i32>} : memref<128x72xbf16, #tpu.memory_space<vmem>>, vector<128x8xbf16>,
    %c0_18 = arith.constant 0 : index
    %c0_19 = arith.constant 0 : index
    %41 = vector.load %arg3[%c0_18, %c0_19] : memref<16x72xbf16, #tpu.memory_space<vmem>>, vector<16x72xbf16>
    %c0_20 = arith.constant 0 : index
    %c0_21 = arith.constant 0 : index
    %42 = vector.load %arg7[%c0_20, %c0_21] : memref<128x72xbf16, #tpu.memory_space<vmem>>, vector<128x72xbf16>
    %cst = arith.constant dense<0.000000e+00> : vector<16x128xf32>
    %43 = tpu.matmul %41, %42, %cst {dimension_numbers = #tpu.dot_dimension_numbers<[1], [1], [0], [0], [0, 0, 1, 0], [], []>} : vector<16x72xbf16>, vector<128x72xbf16>, vector<16x128xf32> -> vector<16x128xf32>
    %c0_22 = arith.constant 0 : index
    %c0_23 = arith.constant 0 : index
    %44 = vector.load %arg4[%c0_22, %c0_23] : memref<16x1xf32, #tpu.memory_space<vmem>>, vector<16x1xf32>
    %45 = vector.broadcast %44 : vector<16x1xf32> to vector<16x128xf32>
    %46 = arith.mulf %43, %45 : vector<16x128xf32>
    %c0_24 = arith.constant 0 : index
    %c0_25 = arith.constant 0 : index
    %47 = vector.load %arg5[%c0_24, %c0_25] : memref<16x1xf32, #tpu.memory_space<vmem>>, vector<16x1xf32>
    %48 = vector.broadcast %47 : vector<16x1xf32> to vector<16x128xf32>
    %49 = arith.addf %46, %48 : vector<16x128xf32>
    %c0_26 = arith.constant 0 : index
    %c0_27 = arith.constant 0 : index
    %c0_28 = arith.constant 0 : index
    %50 = vector.load %arg6[%c0_26, %c0_27, %c0_28] : memref<1x16x128xf32, #tpu.memory_space<vmem>>, vector<1x16x128xf32>
    %51 = vector.shape_cast %50 : vector<1x16x128xf32> to vector<16x128xf32>
    %52 = vector.shape_cast %49 : vector<16x128xf32> to vector<1x16x128xf32>
    tpu.vector_store %arg6[%c0_26, %c0_27, %c0_28], %52 {strides = array<i32>} : memref<1x16x128xf32, #tpu.memory_space<vmem>>, vector<1x16x128xf32>,
    return
  }
  func.func @transform_0(%arg0: i32, %arg1: i32) -> (i32, i32, i32, i32) {
    %c0_i32 = arith.constant 0 : i32
    %c0_i32_0 = arith.constant 0 : i32
    %c0_i32_1 = arith.constant 0 : i32
    %c0_i32_2 = arith.constant 0 : i32
    return %arg0, %c0_i32, %c0_i32_0, %c0_i32_1 : i32, i32, i32, i32
  }
  func.func @transform_1(%arg0: i32, %arg1: i32) -> (i32, i32) {
    %c0_i32 = arith.constant 0 : i32
    %c0_i32_0 = arith.constant 0 : i32
    %c0_i32_1 = arith.constant 0 : i32
    return %c0_i32, %c0_i32_0 : i32, i32
  }
  func.func @transform_2(%arg0: i32, %arg1: i32) -> (i32, i32) {
    %c0_i32 = arith.constant 0 : i32
    %c0_i32_0 = arith.constant 0 : i32
    %c0_i32_1 = arith.constant 0 : i32
    return %c0_i32, %c0_i32_0 : i32, i32
  }
  func.func @transform_3(%arg0: i32, %arg1: i32) -> (i32, i32) {
    %c0_i32 = arith.constant 0 : i32
    %c0_i32_0 = arith.constant 0 : i32
    %c0_i32_1 = arith.constant 0 : i32
    return %c0_i32, %c0_i32_0 : i32, i32
  }
  func.func @transform_4(%arg0: i32, %arg1: i32) -> (i32, i32, i32) {
    %c0_i32 = arith.constant 0 : i32
    %c0_i32_0 = arith.constant 0 : i32
    return %arg0, %c0_i32, %arg1 : i32, i32, i32
  }
}

</mosaic_0001>

<bundles_post_ra>
// kernel: dil_conv_forward.1
= control target key start
LH: loop header
LB: loop body
LE: loop exit
PB: predicated region body
PF: predicated region fallthrough
CT: control target
= control target key end

     0   :  { %s1836_s15 = smov 0   ;;  %s1838_s16 = smov 0   ;;  %s2524_s0 = inlined_call_operand.vmem [shape: bf16[4,20,20,8], index: 0, kind: input, shape index: {}]   ;;  %s2525_s1 = inlined_call_operand.vmem [shape: bf16[16,72], index: 1, kind: input, shape index: {}]   ;;  %s2526_s2 = inlined_call_operand.vmem [shape: f32[16,1], index: 2, kind: input, shape index: {}]   ;;  %s2527_s3 = inlined_call_operand.vmem [shape: f32[16,1], index: 3, kind: input, shape index: {}]   ;;  %s2528_s4 = inlined_call_operand.vmem [shape: f32[4,16,256], index: 4, kind: output, shape index: {}]  }
   0x1   :  { %s1840_s17 = smov 0   ;;  %s1842_s18 = smov 0  }
   0x2   :  { %s1844_s19 = smov 0   ;;  %s1846_s20 = smov 0  }
   0x3   :  { %s1848_s21 = smov 0  }
   0x4 LB: > { %s23_s22 = sadd.s32 1, %s1790_s19  ;;  %s26_s23 = sadd.s32 1, %s1794_s20  ;;  %s1798_s21 = sphi %s1848_s21, %s14_s21   ;;  %s1794_s20 = sphi %s1846_s20, %s2539_s20   ;;  %s1790_s19 = sphi %s1844_s19, %s2538_s19   ;;  %s1786_s18 = sphi %s1842_s18, %s2537_s18   ;;  %s1782_s17 = sphi %s1840_s17, %s2536_s17   ;;  %s1778_s16 = sphi %s1838_s16, %s2535_s16   ;;  %s1774_s15 = sphi %s1836_s15, %s2534_s15  }
   0x5   : > { %p24_p0 = scmp.ge.s32.totalorder %s23_s22, 2  ;;  %s1437_s24 = sadd.s32 4294967295, %s1798_s21  }
   0x6   : > { %p134_p1 = scmp.ne.s32.totalorder %s1778_s16, %s1774_s15  ;;  %p135_p2 = scmp.eq.s32.totalorder %s1437_s24, 7 }
   0x7   : > { %s2541_s22 = smov (%p24_p0, %s23_s22), 0  ;;  %s2543_s23 = smov (!%p24_p0, %s26_s23), %s1794_s20 }
   0x8   : > { %s120_s25 = ssub.s32 %s1790_s19, %s2541_s22  ;;  %p28_p3 = scmp.ge.s32.totalorder %s2543_s23, 4 }
   0x9   : > { %p1441_p4 = scmp.ge.s32.totalorder %s1798_s21, 1  ;;  %p1882_p5 = por %p135_p2, %p134_p1 }
   0xa   : > { %p176_p6 = scmp.lt.s32.totalorder %s1798_s21, 9  ;;  %s2545_s23 = smov (%p28_p3, %s2543_s23), 0 }
   0xb   : > { %s119_s27 = ssub.s32 %s1794_s20, %s2545_s23  ;;  %s124_s29 = sadd.s32 1, %s1778_s16 }
   0xc   : > { %p177_p7 = pnand %p1441_p4, %p176_p6  ;;  %s121_s28 = sor.u32 %s120_s25, %s119_s27 }
   0xd   : > { %p122_p8 = scmp.eq.s32.totalorder %s121_s28, 0  ;;  %p201_p9 = scmp.lt.s32.totalorder (!%p177_p7), %s1786_s18, 3  ;;  %vm300_vm0 = vcmask (!%p177_p7), 1042432   ;;  %vm301_vm1 = vcmask (!%p177_p7), 1046532   ;;  %vm416_vm2 = vcmask (!%p177_p7), 1041408   ;;  %vm417_vm3 = vcmask (!%p177_p7), 1045508  }
   0xe   : > { %180 = sbr.rel (%p177_p7) target bundleno = 519 (0x207), region = 36  ;;  %vm1911_vm4 = vmor (!%p177_p7), %vm300_vm0, %vm301_vm1  ;;  %s1800_s12 = smov (!%p177_p7), 24   ;;  %vm283_vm6 = vcmask (!%p177_p7), 64512   ;;  %vm407_vm7 = vcmask (!%p177_p7), 130112   ;;  %vm523_vm8 = vcmask (!%p177_p7), 195712   ;;  %vm624_vm9 = vcmask (!%p177_p7), 261312  }
   0xf   : > { %s1893_s30 = scalar_select %p122_p8, %s1778_s16, %s124_s29  }
  0x10   : > { %s1626_s6 = smul.u32 (!%p177_p7), 96, %s1782_s17  ;;  %vm1923_vm5 = vmor (!%p177_p7), %vm416_vm2, %vm417_vm3  ;;  %s1801_s13 = smov (!%p177_p7), 48   ;;  %vm745_vm10 = vcmask (!%p177_p7), 326912   ;;  %vm858_vm11 = vcmask (!%p177_p7), 392512   ;;  %vm959_vm12 = vcmask (!%p177_p7), 458112   ;;  %vm1809_vm13 = vmmov (!%p177_p7), 0  }
  0x11   : > { %s1802_s14 = smov (!%p177_p7), 8   ;;  %s1803_s24 = smov (!%p177_p7), 32   ;;  %vm1080_vm14 = vcmask (!%p177_p7), 523712   ;;  %vm1193_vm15 = vcmask (!%p177_p7), 589312   ;;  %vm1217_vm0 = vcmask (!%p177_p7), 588800  }
  0x12   : > { %s1804_s25 = smov (!%p177_p7), 16   ;;  %s1805_s27 = smov (!%p177_p7), 64  }
  0x13   : > { %s1806_s28 = smov (!%p177_p7), 40   ;;  %s1807_s29 = smov (!%p177_p7), 56  }
  0x15   : > { %s202_s5 = scalar_select %p201_p9, %s1786_s18, 3 }
  0x17   : > { %s1656_s7 = smul.u32 240, %s202_s5 }
  0x19   : > { %s205_s10 = scalar_lea.vmem %s2524_s0, %s1656_s7 }
  0x1a   : > { %s1901_s11 = scalar_lea.vmem %s205_s10, %s1626_s6 }
  0x1b   : > { %v1489_v0 = vld [vmem:[%s1901_s11 + $0x18] sm:$0xf]  ;;  %v1490_v1 = vld [vmem:[%s1901_s11 + $0x1c] sm:$0xf]  ;;  %v1906_v2 = vld [vmem:[%s1901_s11] sm:$0xf] }
  0x1c   : > { %v1513_v3 = vcombine.low %v1489_v0, %v1490_v1  ;;  %v1521_v4 = vrot.slane %v1489_v0, 9  ;;  %v643_v5 = vrot.slane %v1490_v1, 5  ;;  %v1909_v6 = vld [vmem:[%s1901_s11 + $0x4] sm:$0xf]  ;;  %v756_v8 = vrot.slane %v1490_v1, 6 }
  0x1d   : > { %v213_v9 = vld [vmem:[%s1901_s11 + $0x8] sm:$0x3]  ;;  %v1455_v10 = vrot.slane %v1906_v2, 9  ;;  %v305_v11 = vrot.slane %v1909_v6, 5  ;;  %v1471_v12 = vrot.slane %v1906_v2, 10  ;;  %v1537_v14 = vrot.slane %v1489_v0, 10 }
  0x1e   : > { %v645_v13 = vrot.slane %v643_v5, 4  ;;  %600 = vrot.lane.b32.xlu1 %v1513_v3, %s1800_s12  ;;  %v308_v15 = vrot.slane %v213_v9, 5  ;;  %v1555_v16 = vld [vmem:[%s1901_s11 + $0x30] sm:$0xf]  ;;  %v421_v18 = vrot.slane %v1909_v6, 6  ;;  %v758_v19 = vrot.slane %v756_v8, 4 }
  0x1f   : > { %v306_v20 = vsel %vm1911_vm4, %v1455_v10, %v305_v11  ;;  %v307_v21 = vrot.slane %v305_v11, 4  ;;  %v424_v22 = vrot.slane %v213_v9, 6  ;;  %v1556_v23 = vld [vmem:[%s1901_s11 + $0x34] sm:$0xf]  ;;  %v1587_v25 = vrot.slane %v1555_v16, 9 }
  0x20   : > { %v1579_v24 = vcombine.low %v1555_v16, %v1556_v23  ;;  %v978_v26 = vrot.slane %v1556_v23, 5  ;;  %v1603_v27 = vrot.slane %v1555_v16, 10  ;;  %v1491_v28 = vld [vmem:[%s1901_s11 + $0x20] sm:$0x3]  ;;  %v1091_v30 = vrot.slane %v1556_v23, 6 }
  0x21   : > { %v309_v29 = vsel %vm1911_vm4, %v307_v21, %v308_v15  ;;  %v422_v31 = vsel %vm1923_vm5, %v1471_v12, %v421_v18  ;;  %v423_v32 = vrot.slane %v421_v18, 4  ;;  %v1557_v33 = vld [vmem:[%s1901_s11 + $0x38] sm:$0x3]  ;;  %v644_v35 = vsel %vm1911_vm4, %v1521_v4, %v643_v5  ;;  %v1945_v42 = vld [vmem:[%s1901_s11 + $0x10] sm:$0xf] }
  0x22   : > { %v1463_v34 = vcombine.low %v306_v20, %v309_v29  ;;  %935 = vrot.lane.b32.xlu1 %v1579_v24, %s1801_s13  ;;  %v646_v36 = vrot.slane %v1491_v28, 5  ;;  %v759_v37 = vrot.slane %v1491_v28, 6  ;;  %v757_v39 = vsel %vm1923_vm5, %v1537_v14, %v756_v8  ;;  %v1953_v46 = vld [vmem:[%s1901_s11 + $0xc] sm:$0xf]  ;;  %v216_v47 = vld [vmem:[%s1901_s11 + $0x14] sm:$0x3] }
  0x23   : > { %v425_v38 = vsel %vm1923_vm5, %v423_v32, %v424_v22  ;;  %v980_v40 = vrot.slane %v978_v26, 4  ;;  %v981_v41 = vrot.slane %v1557_v33, 5  ;;  %v979_v49 = vsel %vm1911_vm4, %v1587_v25, %v978_v26  ;;  %v1962_v55 = vld [vmem:[%s1901_s11 + $0x24] sm:$0xf]  ;;  %v1970_v60 = vld [vmem:[%s1901_s11 + $0x28] sm:$0xf] }
  0x24   : > { %383 = vrot.lane.b32.xlu0 %v1463_v34, %s1802_s14  ;;  %v1479_v43 = vcombine.low %v422_v31, %v425_v38  ;;  %v647_v44 = vsel %vm1911_vm4, %v645_v13, %v646_v36  ;;  %v760_v45 = vsel %vm1923_vm5, %v758_v19, %v759_v37  ;;  %v1093_v50 = vrot.slane %v1091_v30, 4  ;;  %v1494_v1 = vld [vmem:[%s1901_s11 + $0x2c] sm:$0x3]  ;;  %v1559_v13 = vld [vmem:[%s1901_s11 + $0x40] sm:$0xf] }
  0x25   : > { %v1529_v48 = vcombine.low %v644_v35, %v647_v44  ;;  %v1545_v51 = vcombine.low %v757_v39, %v760_v45  ;;  %v1092_v52 = vsel %vm1923_vm5, %v1603_v27, %v1091_v30  ;;  %v1094_v53 = vrot.slane %v1557_v33, 6  ;;  %v1558_v21 = vld [vmem:[%s1901_s11 + $0x3c] sm:$0xf]  ;;  %v1560_v22 = vld [vmem:[%s1901_s11 + $0x44] sm:$0x3] }
  0x26   : > { %v312_v54 = vrot.slane %v1945_v42, 5  ;;  %v982_v56 = vsel %vm1911_vm4, %v980_v40, %v981_v41  ;;  %v1472_v57 = vrot.slane %v1953_v46, 10  ;;  %v428_v58 = vrot.slane %v1945_v42, 6  ;;  %v2000_v29 = vld [vmem:[%s1901_s11 + $0x1c] sm:$0xf] }
  0x27   : > { %721 = vrot.lane.b32.xlu1 %v1529_v48, %s1803_s24  ;;  %v431_v59 = vrot.slane %v216_v47, 6  ;;  %v1095_v61 = vsel %vm1923_vm5, %v1093_v50, %v1094_v53  ;;  %v1456_v62 = vrot.slane %v1953_v46, 9  ;;  %v315_v0 = vrot.slane %v216_v47, 5  ;;  %v2004_v34 = vld [vmem:[%s1901_s11 + $0x18] sm:$0xf] }
  0x28   : > { %499 = vrot.lane.b32.xlu0 %v1479_v43, %s1804_s25  ;;  %v314_v63 = vrot.slane %v312_v54, 4  ;;  %v1611_v3 = vcombine.low %v1092_v52, %v1095_v61  ;;  %v429_v4 = vsel %vm1923_vm5, %v1472_v57, %v428_v58  ;;  %v430_v5 = vrot.slane %v428_v58, 4  ;;  %v219_v36 = vld [vmem:[%s1901_s11 + $0x20] sm:$0x3]  ;;  %v2013_v40 = vld [vmem:[%s1901_s11 + $0x34] sm:$0xf] }
  0x29   : > { %v1522_v8 = vrot.slane %v1962_v55, 9  ;;  %v650_v9 = vrot.slane %v1970_v60, 5  ;;  %v763_v11 = vrot.slane %v1970_v60, 6  ;;  %v653_v12 = vrot.slane %v1494_v1, 5 }
  0x2a   : > { %v432_v10 = vsel %vm1923_vm5, %v430_v5, %v431_v59  ;;  %v1595_v14 = vcombine.low %v979_v49, %v982_v56  ;;  %v313_v19 = vsel %vm1911_vm4, %v1456_v62, %v312_v54  ;;  %v316_v20 = vsel %vm1911_vm4, %v314_v63, %v315_v0  ;;  %v1497_v56 = vld [vmem:[%s1901_s11 + $0x38] sm:$0x3] }
  0x2b   : > { %1169 = vrot.lane.b32.xlu1 %v1611_v3, %s1805_s27  ;;  %v1480_v15 = vcombine.low %v429_v4, %v432_v10  ;;  %v651_v16 = vsel %vm1911_vm4, %v1522_v8, %v650_v9  ;;  %v652_v18 = vrot.slane %v650_v9, 4  ;;  %v1538_v23 = vrot.slane %v1962_v55, 10  ;;  %v1562_v8 = vld [vmem:[%s1901_s11 + $0x4c] sm:$0xf] }
  0x2c   : > { %834 = vrot.lane.b32.xlu0 %v1545_v51, %s1806_s28  ;;  %v1098_v25 = vrot.slane %v1559_v13, 6  ;;  %v765_v27 = vrot.slane %v763_v11, 4  ;;  %v766_v28 = vrot.slane %v1494_v1, 6  ;;  %v1464_v30 = vcombine.low %v313_v19, %v316_v20  ;;  %v2025_v51 = vld [vmem:[%s1901_s11 + $0x30] sm:$0xf] }
  0x2d   : > { %v654_v24 = vsel %vm1911_vm4, %v652_v18, %v653_v12  ;;  %v1604_v31 = vrot.slane %v1558_v21, 10  ;;  %v1101_v33 = vrot.slane %v1560_v22, 6  ;;  %v985_v35 = vrot.slane %v1559_v13, 5  ;;  %v1563_v19 = vld [vmem:[%s1901_s11 + $0x50] sm:$0x3] }
  0x2e   : > { %v1530_v26 = vcombine.low %v651_v16, %v654_v24  ;;  %v1100_v32 = vrot.slane %v1098_v25, 4  ;;  %v1514_v37 = vcombine.low %v1962_v55, %v1970_v60  ;;  %v764_v38 = vsel %vm1923_vm5, %v1538_v23, %v763_v11  ;;  %v2057_v20 = vld [vmem:[%s1901_s11 + $0x28] sm:$0xf] }
  0x2f   : > { %501 = vrot.lane.b32.xlu1 %v1480_v15, %s1804_s25  ;;  %v435_v39 = vrot.slane %v2000_v29, 6  ;;  %v767_v41 = vsel %vm1923_vm5, %v765_v27, %v766_v28  ;;  %v1580_v43 = vcombine.low %v1558_v21, %v1559_v13  ;;  %v1588_v44 = vrot.slane %v1558_v21, 9 }
  0x30   : > { %1056 = vrot.lane.b32.xlu0 %v1595_v14, %s1807_s29  ;;  %v1473_v45 = vrot.slane %v2004_v34, 10  ;;  %v1099_v47 = vsel %vm1923_vm5, %v1604_v31, %v1098_v25  ;;  %v1102_v48 = vsel %vm1923_vm5, %v1100_v32, %v1101_v33  ;;  %v438_v50 = vrot.slane %v219_v36, 6  ;;  %v1561_v14 = vld [vmem:[%s1901_s11 + $0x48] sm:$0xf]  ;;  %v222_v33 = vld [vmem:[%s1901_s11 + $0x2c] sm:$0x3] }
  0x31   : > { %v437_v49 = vrot.slane %v435_v39, 4  ;;  %v987_v52 = vrot.slane %v985_v35, 4  ;;  %v988_v53 = vrot.slane %v1560_v22, 5  ;;  %v319_v54 = vrot.slane %v2000_v29, 5 }
  0x32   : > { %v657_v55 = vrot.slane %v2013_v40, 5  ;;  %v1546_v57 = vcombine.low %v764_v38, %v767_v41  ;;  %v986_v58 = vsel %vm1911_vm4, %v1588_v44, %v985_v35  ;;  %v1612_v59 = vcombine.low %v1099_v47, %v1102_v48  ;;  %v2068_v35 = vld [vmem:[%s1901_s11 + $0x40] sm:$0xf]  ;;  %v2084_v48 = vld [vmem:[%s1901_s11 + $0x3c] sm:$0xf] }
  0x33   : > { %723 = vrot.lane.b32.xlu1 %v1530_v26, %s1803_s24  ;;  %v436_v60 = vsel %vm1923_vm5, %v1473_v45, %v435_v39  ;;  %v439_v61 = vsel %vm1923_vm5, %v437_v49, %v438_v50  ;;  %v1523_v62 = vrot.slane %v2025_v51, 9  ;;  %v660_v0 = vrot.slane %v1497_v56, 5 }
  0x34   : > { %385 = vrot.lane.b32.xlu0 %v1464_v30, %s1802_s14  ;;  %v659_v63 = vrot.slane %v657_v55, 4  ;;  %v989_v1 = vsel %vm1911_vm4, %v987_v52, %v988_v53  ;;  %v1457_v3 = vrot.slane %v2004_v34, 9  ;;  %v321_v4 = vrot.slane %v319_v54, 4  ;;  %v2063_v30 = vld [vmem:[%s1901_s11 + $0x24] sm:$0xf] }
  0x35   : > { %v322_v5 = vrot.slane %v219_v36, 5  ;;  %v1481_v9 = vcombine.low %v436_v60, %v439_v61  ;;  %v770_v10 = vrot.slane %v2013_v40, 6  ;;  %v1596_v11 = vcombine.low %v986_v58, %v989_v1  ;;  %v1500_v53 = vld [vmem:[%s1901_s11 + $0x44] sm:$0x3] }
  0x36   : > { %v658_v12 = vsel %vm1911_vm4, %v1523_v62, %v657_v55  ;;  %v661_v13 = vsel %vm1911_vm4, %v659_v63, %v660_v0  ;;  %v1105_v15 = vrot.slane %v1562_v8, 6  ;;  %v320_v16 = vsel %vm1911_vm4, %v1457_v3, %v319_v54  ;;  %v1565_v3 = vld [vmem:[%s1901_s11 + $0x58] sm:$0xf] }
  0x37   : > { %937 = vrot.lane.b32.xlu1 %v1580_v43, %s1801_s13  ;;  %v323_v18 = vsel %vm1911_vm4, %v321_v4, %v322_v5  ;;  %v1539_v21 = vrot.slane %v2025_v51, 10  ;;  %v1531_v22 = vcombine.low %v658_v12, %v661_v13  ;;  %v772_v23 = vrot.slane %v770_v10, 4 }
  0x38   : > { %602 = vrot.lane.b32.xlu0 %v1514_v37, %s1800_s12  ;;  %v773_v24 = vrot.slane %v1497_v56, 6  ;;  %v1605_v25 = vrot.slane %v1561_v14, 10  ;;  %v1465_v26 = vcombine.low %v320_v16, %v323_v18  ;;  %v1107_v27 = vrot.slane %v1105_v15, 4  ;;  %v2116_v16 = vld [vmem:[%s1901_s11 + $0x34] sm:$0xf] }
  0x39   : > { %v1108_v28 = vrot.slane %v1563_v19, 6  ;;  %v442_v31 = vrot.slane %v2057_v20, 6  ;;  %v992_v32 = vrot.slane %v1562_v8, 5  ;;  %v1515_v36 = vcombine.low %v2025_v51, %v2013_v40 }
  0x3a   : > { %v771_v37 = vsel %vm1923_vm5, %v1539_v21, %v770_v10  ;;  %v1581_v38 = vcombine.low %v1561_v14, %v1562_v8  ;;  %v774_v39 = vsel %vm1923_vm5, %v772_v23, %v773_v24  ;;  %v1589_v41 = vrot.slane %v1561_v14, 9 }
  0x3b   : > { %1171 = vrot.lane.b32.xlu1 %v1612_v59, %s1805_s27  ;;  %v1106_v43 = vsel %vm1923_vm5, %v1605_v25, %v1105_v15  ;;  %v1474_v44 = vrot.slane %v2063_v30, 10  ;;  %v1109_v40 = vsel %vm1923_vm5, %v1107_v27, %v1108_v28  ;;  %v444_v45 = vrot.slane %v442_v31, 4  ;;  %v1566_v15 = vld [vmem:[%s1901_s11 + $0x5c] sm:$0x3]  ;;  %v2122_v27 = vld [vmem:[%s1901_s11 + $0x30] sm:$0xf] }
  0x3c   : > { %836 = vrot.lane.b32.xlu0 %v1546_v57, %s1806_s28  ;;  %v445_v47 = vrot.slane %v222_v33, 6  ;;  %v664_v49 = vrot.slane %v2068_v35, 5  ;;  %v994_v50 = vrot.slane %v992_v32, 4  ;;  %v995_v51 = vrot.slane %v1563_v19, 5 }
  0x3d   : > { %v326_v52 = vrot.slane %v2057_v20, 5  ;;  %v1547_v54 = vcombine.low %v771_v37, %v774_v39  ;;  %v993_v55 = vsel %vm1911_vm4, %v1589_v41, %v992_v32  ;;  %v1613_v56 = vcombine.low %v1106_v43, %v1109_v40  ;;  %v225_v32 = vld [vmem:[%s1901_s11 + $0x38] sm:$0x3] }
  0x3e   : > { %v443_v57 = vsel %vm1923_vm5, %v1474_v44, %v442_v31  ;;  %v446_v58 = vsel %vm1923_vm5, %v444_v45, %v445_v47  ;;  %v1524_v59 = vrot.slane %v2084_v48, 9  ;;  %v666_v60 = vrot.slane %v664_v49, 4  ;;  %v2143_v47 = vld [vmem:[%s1901_s11 + $0x48] sm:$0xf] }
  0x3f   : > { %503 = vrot.lane.b32.xlu1 %v1481_v9, %s1804_s25  ;;  %v667_v61 = vrot.slane %v1500_v53, 5  ;;  %v996_v62 = vsel %vm1911_vm4, %v994_v50, %v995_v51  ;;  %v1458_v63 = vrot.slane %v2063_v30, 9  ;;  %v328_v0 = vrot.slane %v326_v52, 4 }
  0x40   : > { %1058 = vrot.lane.b32.xlu0 %v1596_v11, %s1807_s29  ;;  %v329_v1 = vrot.slane %v222_v33, 5  ;;  %v1482_v4 = vcombine.low %v443_v57, %v446_v58  ;;  %v777_v5 = vrot.slane %v2068_v35, 6  ;;  %v1597_v8 = vcombine.low %v993_v55, %v996_v62  ;;  %v1564_v11 = vld [vmem:[%s1901_s11 + $0x54] sm:$0xf]  ;;  %v2127_v33 = vld [vmem:[%s1901_s11 + $0x4c] sm:$0xf] }
  0x41   : > { %v665_v9 = vsel %vm1911_vm4, %v1524_v59, %v664_v49  ;;  %v668_v10 = vsel %vm1911_vm4, %v666_v60, %v667_v61  ;;  %v1112_v12 = vrot.slane %v1565_v3, 6  ;;  %v327_v13 = vsel %vm1911_vm4, %v1458_v63, %v326_v52  ;;  %v1503_v52 = vld [vmem:[%s1901_s11 + $0x50] sm:$0x3] }
  0x42   : > { %v330_v14 = vsel %vm1911_vm4, %v328_v0, %v329_v1  ;;  %v1540_v18 = vrot.slane %v2084_v48, 10  ;;  %v1532_v19 = vcombine.low %v665_v9, %v668_v10  ;;  %v779_v21 = vrot.slane %v777_v5, 4  ;;  %v1568_v1 = vld [vmem:[%s1901_s11 + $0x64] sm:$0xf]  ;;  %v1567_v10 = vld [vmem:[%s1901_s11 + $0x60] sm:$0xf] }
  0x43   : > { %725 = vrot.lane.b32.xlu1 %v1531_v22, %s1803_s24  ;;  %v780_v22 = vrot.slane %v1500_v53, 6  ;;  %v1606_v23 = vrot.slane %v1564_v11, 10  ;;  %v1466_v24 = vcombine.low %v327_v13, %v330_v14  ;;  %v1114_v25 = vrot.slane %v1112_v12, 4  ;;  %v1569_v14 = vld [vmem:[%s1901_s11 + $0x68] sm:$0x3] }
  0x44   : > { %387 = vrot.lane.b32.xlu0 %v1465_v26, %s1802_s14  ;;  %v1115_v26 = vrot.slane %v1566_v15, 6  ;;  %v449_v28 = vrot.slane %v2116_v16, 6  ;;  %v999_v31 = vrot.slane %v1565_v3, 5  ;;  %v778_v37 = vsel %vm1923_vm5, %v1540_v18, %v777_v5 }
  0x45   : > { %v781_v39 = vsel %vm1923_vm5, %v779_v21, %v780_v22  ;;  %v1590_v41 = vrot.slane %v1564_v11, 9  ;;  %v1113_v43 = vsel %vm1923_vm5, %v1606_v23, %v1112_v12  ;;  %v1475_v44 = vrot.slane %v2122_v27, 10 }
  0x46   : > { %v451_v40 = vrot.slane %v449_v28, 4  ;;  %v452_v45 = vrot.slane %v225_v32, 6  ;;  %v1001_v49 = vrot.slane %v999_v31, 4  ;;  %v1002_v50 = vrot.slane %v1566_v15, 5  ;;  %v2175_v15 = vld [vmem:[%s1901_s11 + $0x40] sm:$0xf] }
  0x47   : > { %939 = vrot.lane.b32.xlu1 %v1581_v38, %s1801_s13  ;;  %v1582_v38 = vcombine.low %v1564_v11, %v1565_v3  ;;  %v333_v51 = vrot.slane %v2116_v16, 5  ;;  %v1548_v53 = vcombine.low %v778_v37, %v781_v39  ;;  %v1525_v58 = vrot.slane %v2143_v47, 9  ;;  %v2186_v37 = vld [vmem:[%s1901_s11 + $0x58] sm:$0xf] }
  0x48   : > { %604 = vrot.lane.b32.xlu0 %v1515_v36, %s1800_s12  ;;  %v1516_v36 = vcombine.low %v2084_v48, %v2068_v35  ;;  %v1116_v35 = vsel %vm1923_vm5, %v1114_v25, %v1115_v26  ;;  %v671_v48 = vrot.slane %v2127_v33, 5  ;;  %v453_v57 = vsel %vm1923_vm5, %v451_v40, %v452_v45 }
  0x49   : > { %v1614_v55 = vcombine.low %v1113_v43, %v1116_v35  ;;  %v674_v60 = vrot.slane %v1503_v52, 5  ;;  %v1003_v61 = vsel %vm1911_vm4, %v1001_v49, %v1002_v50  ;;  %v1459_v62 = vrot.slane %v2122_v27, 9 }
  0x4a   : > { %v673_v59 = vrot.slane %v671_v48, 4  ;;  %v335_v63 = vrot.slane %v333_v51, 4  ;;  %v336_v0 = vrot.slane %v225_v32, 5  ;;  %v1119_v11 = vrot.slane %v1568_v1, 6 }
  0x4b   : > { %1173 = vrot.lane.b32.xlu1 %v1613_v56, %s1805_s27  ;;  %v450_v56 = vsel %vm1923_vm5, %v1475_v44, %v449_v28  ;;  %v334_v12 = vsel %vm1911_vm4, %v1459_v62, %v333_v51  ;;  %v1541_v18 = vrot.slane %v2143_v47, 10  ;;  %v787_v22 = vrot.slane %v1503_v52, 6  ;;  %v2181_v28 = vld [vmem:[%s1901_s11 + $0x3c] sm:$0xf]  ;;  %v2217_v62 = vld [vmem:[%s1901_s11 + $0x70] sm:$0xf] }
  0x4c   : > { %838 = vrot.lane.b32.xlu0 %v1547_v54, %s1806_s28  ;;  %v1000_v54 = vsel %vm1911_vm4, %v1590_v41, %v999_v31  ;;  %v1483_v3 = vcombine.low %v450_v56, %v453_v57  ;;  %v675_v9 = vsel %vm1911_vm4, %v673_v59, %v674_v60  ;;  %v337_v13 = vsel %vm1911_vm4, %v335_v63, %v336_v0 }
  0x4d   : > { %v1598_v5 = vcombine.low %v1000_v54, %v1003_v61  ;;  %v1607_v23 = vrot.slane %v1567_v10, 10  ;;  %v1121_v25 = vrot.slane %v1119_v11, 4  ;;  %v1122_v26 = vrot.slane %v1569_v14, 6 }
  0x4e   : > { %v456_v31 = vrot.slane %v2175_v15, 6  ;;  %v1006_v32 = vrot.slane %v1568_v1, 5  ;;  %v1583_v41 = vcombine.low %v1567_v10, %v1568_v1  ;;  %v1591_v44 = vrot.slane %v1567_v10, 9 }
  0x4f   : > { %505 = vrot.lane.b32.xlu1 %v1482_v4, %s1804_s25  ;;  %v784_v4 = vrot.slane %v2127_v33, 6  ;;  %v1120_v35 = vsel %vm1923_vm5, %v1607_v23, %v1119_v11  ;;  %v1476_v40 = vrot.slane %v2181_v28, 10  ;;  %v678_v49 = vrot.slane %v2186_v37, 5 }
  0x50   : > { %1060 = vrot.lane.b32.xlu0 %v1597_v8, %s1807_s29  ;;  %v672_v8 = vsel %vm1911_vm4, %v1525_v58, %v671_v48  ;;  %v458_v45 = vrot.slane %v456_v31, 4  ;;  %v2202_v48 = vld [vmem:[%s1901_s11 + $0x54] sm:$0xf]  ;;  %v1008_v50 = vrot.slane %v1006_v32, 4  ;;  %v1009_v51 = vrot.slane %v1569_v14, 5 }
  0x51   : > { %v786_v21 = vrot.slane %v784_v4, 4  ;;  %v785_v39 = vsel %vm1923_vm5, %v1541_v18, %v784_v4  ;;  %v340_v52 = vrot.slane %v2175_v15, 5  ;;  %v457_v57 = vsel %vm1923_vm5, %v1476_v40, %v456_v31  ;;  %v1572_v14 = vld [vmem:[%s1901_s11 + $0x74] sm:$0x3] }
  0x52   : > { %v1526_v59 = vrot.slane %v2202_v48, 9  ;;  %v680_v60 = vrot.slane %v678_v49, 4  ;;  %v1010_v63 = vsel %vm1911_vm4, %v1008_v50, %v1009_v51  ;;  %v1460_v0 = vrot.slane %v2181_v28, 9  ;;  %v2269_v51 = vld [vmem:[%s1901_s11 + $0x60] sm:$0xf] }
  0x53   : > { %727 = vrot.lane.b32.xlu1 %v1532_v19, %s1803_s24  ;;  %v1533_v19 = vcombine.low %v672_v8, %v675_v9  ;;  %v788_v43 = vsel %vm1923_vm5, %v786_v21, %v787_v22  ;;  %v342_v1 = vrot.slane %v340_v52, 4  ;;  %v791_v4 = vrot.slane %v2186_v37, 6  ;;  %v2239_v21 = vld [vmem:[%s1901_s11 + $0x4c] sm:$0xf] }
  0x54   : > { %389 = vrot.lane.b32.xlu0 %v1466_v24, %s1802_s14  ;;  %v1467_v24 = vcombine.low %v334_v12, %v337_v13  ;;  %v1549_v54 = vcombine.low %v785_v39, %v788_v43  ;;  %v1126_v8 = vrot.slane %v2217_v62, 6  ;;  %v1447_v9 = vcombine.low %v1906_v2, %v1909_v6  ;;  %v1570_v13 = vld [vmem:[%s1901_s11 + $0x6c] sm:$0xf]  ;;  %v2252_v43 = vld [vmem:[%s1901_s11 + $0x64] sm:$0xf] }
  0x55   : > { %v679_v11 = vsel %vm1911_vm4, %v1526_v59, %v678_v49  ;;  %v341_v18 = vsel %vm1911_vm4, %v1460_v0, %v340_v52  ;;  %v1542_v2 = vrot.slane %v2202_v48, 10  ;;  %v793_v6 = vrot.slane %v791_v4, 4 }
  0x56   : > { %284 = vst.msk [vmem:[#allocation2] sm:$0xff] %vm283_vm6, %v1447_v9  ;;  %v1013_v39 = vrot.slane %v2217_v62, 5  ;;  %v1584_v40 = vcombine.low %v1570_v13, %v2217_v62  ;;  %v685_v52 = vrot.slane %v2252_v43, 5  ;;  %v1451_v62 = vcombine.low %v2122_v27, %v2116_v16 }
  0x57   : > { %941 = vrot.lane.b32.xlu1 %v1582_v38, %s1801_s13  ;;  %v1517_v38 = vcombine.low %v2143_v47, %v2127_v33  ;;  %v1123_v33 = vsel %vm1923_vm5, %v1121_v25, %v1122_v26  ;;  %v1128_v25 = vrot.slane %v1126_v8, 4  ;;  %v1129_v26 = vrot.slane %v1572_v14, 6 }
  0x58   : > { %606 = vrot.lane.b32.xlu0 %v1516_v36, %s1800_s12  ;;  %v228_v36 = vld [vmem:[%s1901_s11 + $0x44] sm:$0x3]  ;;  %v1615_v56 = vcombine.low %v1120_v35, %v1123_v33  ;;  %v792_v35 = vsel %vm1923_vm5, %v1542_v2, %v791_v4  ;;  %v1016_v33 = vrot.slane %v1572_v14, 5  ;;  %288 = vst.msk [vmem:[#allocation2 + $0x20] sm:$0xff] %vm283_vm6, %v1451_v62 }
  0x59   : > { %v459_v47 = vrot.slane %v228_v36, 6  ;;  %v1130_v49 = vsel %vm1923_vm5, %v1128_v25, %v1129_v26  ;;  %v232_v26 = vld [vmem:[%s1901_s11 + $0x54] sm:$0xf] }
  0x5b   : > { %1175 = vrot.lane.b32.xlu1 %v1614_v55, %s1805_s27  ;;  %v1007_v55 = vsel %vm1911_vm4, %v1591_v44, %v1006_v32  ;;  %v460_v58 = vsel %vm1923_vm5, %v458_v45, %v459_v47  ;;  %v2246_v32 = vld [vmem:[%s1901_s11 + $0x48] sm:$0xf]  ;;  %v1518_v44 = vcombine.low %v2202_v48, %v2186_v37 }
  0x5c   : > { %840 = vrot.lane.b32.xlu0 %v1548_v53, %s1806_s28  ;;  %v1506_v53 = vld [vmem:[%s1901_s11 + $0x5c] sm:$0x3]  ;;  %v1599_v10 = vcombine.low %v1007_v55, %v1010_v63  ;;  %v1477_v37 = vrot.slane %v2246_v32, 10  ;;  %v1015_v55 = vrot.slane %v1013_v39, 4  ;;  %v1452_v63 = vcombine.low %v2181_v28, %v2175_v15 }
  0x5d   : > { %v681_v61 = vrot.slane %v1506_v53, 5  ;;  %v794_v22 = vrot.slane %v1506_v53, 6  ;;  %v1448_v53 = vcombine.low %v1953_v46, %v1945_v42  ;;  %v1450_v42 = vcombine.low %v2063_v30, %v2057_v20 }
  0x5e   : > { %v1453_v0 = vcombine.low %v2246_v32, %v2239_v21  ;;  %v687_v20 = vrot.slane %v685_v52, 4  ;;  %v1017_v16 = vsel %vm1911_vm4, %v1015_v55, %v1016_v33  ;;  %v1461_v27 = vrot.slane %v2246_v32, 9  ;;  %289 = vst.msk [vmem:[#allocation2 + $0x28] sm:$0xff] %vm283_vm6, %v1452_v63 }
  0x5f   : > { %507 = vrot.lane.b32.xlu1 %v1483_v3, %s1804_s25  ;;  %v343_v3 = vrot.slane %v228_v36, 5  ;;  %v682_v12 = vsel %vm1911_vm4, %v680_v60, %v681_v61  ;;  %v463_v36 = vrot.slane %v2239_v21, 6  ;;  %v795_v45 = vsel %vm1923_vm5, %v793_v6, %v794_v22  ;;  %285 = vst.msk [vmem:[#allocation2 + $0x8] sm:$0xff] %vm283_vm6, %v1448_v53  ;;  %287 = vst.msk [vmem:[#allocation2 + $0x18] sm:$0xff] %vm283_vm6, %v1450_v42 }
  0x60   : > { %1062 = vrot.lane.b32.xlu0 %v1598_v5, %s1807_s29  ;;  %v1484_v5 = vcombine.low %v457_v57, %v460_v58  ;;  %v1534_v23 = vcombine.low %v679_v11, %v682_v12  ;;  %v2278_v57 = vld [vmem:[%s1901_s11 + $0x68] sm:$0x3]  ;;  %v1550_v58 = vcombine.low %v792_v35, %v795_v45  ;;  %v1808_v60 = vmov 0.0   ;;  %290 = vst.msk [vmem:[#allocation2 + $0x30] sm:$0xff] %vm283_vm6, %v1453_v0  ;;  %v1573_v11 = vld [vmem:[%s1901_s11 + $0x78] sm:$0xf] }
  0x61   : > { %v465_v48 = vrot.slane %v463_v36, 4  ;;  %1636 = vmatprep.subr.bf16.mxu0 %v1808_v60  ;;  %v1449_v61 = vcombine.low %v2004_v34, %v2000_v29  ;;  %v464_v46 = vsel %vm1923_vm5, %v1477_v37, %v463_v36  ;;  %v1527_v34 = vrot.slane %v2269_v51, 9  ;;  %v1575_v12 = vld [vmem:[%s1901_s11 + $0x80] sm:$0x3]  ;;  %v234_v36 = vld [vmem:[%s1901_s11 + $0x5c] sm:$0x3]  ;;  %1652 = vmatprep.mubr.msk.bf16.mxu0 %vm1809_vm13, %v1808_v60 }
  0x62   : > { %v688_v30 = vrot.slane %v2278_v57, 5  ;;  %v801_v2 = vrot.slane %v2278_v57, 6  ;;  %v1609_v22 = vrot.slane %v1573_v11, 10  ;;  %v1593_v35 = vrot.slane %v1573_v11, 9  ;;  %v2345_v37 = vld [vmem:[%s1901_s11 + $0x6c] sm:$0xf] }
  0x63   : > { %729 = vrot.lane.b32.xlu1 %v1533_v19, %s1803_s24  ;;  %v344_v19 = vsel %vm1911_vm4, %v342_v1, %v343_v3  ;;  %v1574_v1 = vld [vmem:[%s1901_s11 + $0x7c] sm:$0xf]  ;;  %286 = vst.msk [vmem:[#allocation2 + $0x10] sm:$0xff] %vm283_vm6, %v1449_v61  ;;  %v798_v3 = vrot.slane %v2252_v43, 6  ;;  %v686_v9 = vsel %vm1911_vm4, %v1527_v34, %v685_v52  ;;  %v1023_v52 = vrot.slane %v1575_v12, 5 }
  0x64   : > { %391 = vrot.lane.b32.xlu0 %v1467_v24, %s1802_s14  ;;  %v1608_v24 = vrot.slane %v1570_v13, 10  ;;  %v1468_v31 = vcombine.low %v341_v18, %v344_v19  ;;  %v233_v18 = vld [vmem:[%s1901_s11 + $0x58] sm:$0xf]  ;;  %v1543_v19 = vrot.slane %v2269_v51, 10  ;;  %v1020_v32 = vrot.slane %v1574_v1, 5 }
  0x65   : > { %v354_v53 = vrot.slane %v233_v18, 5  ;;  %v1528_v61 = vrot.slane %v2345_v37, 9  ;;  %v1462_v63 = vrot.slane %v232_v26, 9  ;;  %v1577_v34 = vld [vmem:[%s1901_s11 + $0x88] sm:$0xf] }
  0x66   : > { %v1127_v47 = vsel %vm1923_vm5, %v1608_v24, %v1126_v8  ;;  %v1136_v24 = vrot.slane %v1575_v12, 6 }
  0x67   : > { %943 = vrot.lane.b32.xlu1 %v1583_v41, %s1801_s13  ;;  %v231_v41 = vld [vmem:[%s1901_s11 + $0x50] sm:$0x3]  ;;  %v1616_v59 = vcombine.low %v1127_v47, %v1130_v49  ;;  %v1478_v47 = vrot.slane %v232_v26, 10  ;;  %v473_v49 = vrot.slane %v234_v36, 6  ;;  %v356_v0 = vrot.slane %v354_v53, 4 }
  0x68   : > { %608 = vrot.lane.b32.xlu0 %v1517_v38, %s1800_s12  ;;  %v1592_v38 = vrot.slane %v1570_v13, 9  ;;  %v466_v50 = vrot.slane %v231_v41, 6  ;;  %v350_v28 = vrot.slane %v231_v41, 5  ;;  %v799_v41 = vsel %vm1923_vm5, %v1543_v19, %v798_v3 }
  0x6a   : > { %v467_v29 = vsel %vm1923_vm5, %v465_v48, %v466_v50  ;;  %v1454_v50 = vcombine.low %v232_v26, %v233_v18 }
  0x6b   : > { %1177 = vrot.lane.b32.xlu1 %v1615_v56, %s1805_s27  ;;  %v347_v56 = vrot.slane %v2239_v21, 5  ;;  %v1485_v4 = vcombine.low %v464_v46, %v467_v29  ;;  %v800_v21 = vrot.slane %v798_v3, 4  ;;  %v357_v29 = vrot.slane %v234_v36, 5 }
  0x6c   : > { %842 = vrot.lane.b32.xlu0 %v1549_v54, %s1806_s28  ;;  %v1014_v54 = vsel %vm1911_vm4, %v1592_v38, %v1013_v39  ;;  %v2330_v38 = vld [vmem:[%s1901_s11 + $0x70] sm:$0xf]  ;;  %v1519_v39 = vcombine.low %v2269_v51, %v2252_v43  ;;  %v1022_v51 = vrot.slane %v1020_v32, 4  ;;  %291 = vst.msk [vmem:[#allocation2 + $0x38] sm:$0xff] %vm283_vm6, %v1454_v50  ;;  %v1810_v50 = vmov 0  }
  0x6d   : > { %v349_v15 = vrot.slane %v347_v56, 4  ;;  %v1600_v8 = vcombine.low %v1014_v54, %v1017_v16  ;;  %v348_v13 = vsel %vm1911_vm4, %v1461_v27, %v347_v56  ;;  %v692_v48 = vrot.slane %v2330_v38, 5  ;;  %v1512_v54 = vld [vmem:[%s1901_s11 + $0x74] sm:$0x3]  ;;  %1725 = vset.pattern.permute.xlu1 %v1810_v50  ;;  %1724 = vset.pattern.permute.xlu0 %v1810_v50 }
  0x6e   : > { %v1021_v56 = vsel %vm1911_vm4, %v1593_v35, %v1020_v32  ;;  %v695_v46 = vrot.slane %v1512_v54, 5  ;;  %v1024_v62 = vsel %vm1911_vm4, %v1022_v51, %v1023_v52  ;;  %v1140_v27 = vrot.slane %v1577_v34, 6  ;;  %v1300_v52 = vld [vmem:[%s2527_s3] sm:$0xff] }
  0x6f   : > { %509 = vrot.lane.b32.xlu1 %v1484_v5, %s1804_s25  ;;  %v1133_v5 = vrot.slane %v1574_v1, 6  ;;  %v351_v14 = vsel %vm1911_vm4, %v349_v15, %v350_v28  ;;  %v694_v42 = vrot.slane %v692_v48, 4  ;;  %v355_v15 = vsel %vm1911_vm4, %v1462_v63, %v354_v53  ;;  %v1301_v53 = vld [vmem:[%s2527_s3 + $0x8] sm:$0xff] }
  0x70   : > { %1064 = vrot.lane.b32.xlu0 %v1599_v10, %s1807_s29  ;;  %v689_v10 = vsel %vm1911_vm4, %v687_v20, %v688_v30  ;;  %v1469_v25 = vcombine.low %v348_v13, %v351_v14  ;;  %v1601_v30 = vcombine.low %v1021_v56, %v1024_v62  ;;  %v358_v28 = vsel %vm1911_vm4, %v356_v0, %v357_v29 }
  0x71   : > { %v1535_v6 = vcombine.low %v686_v9, %v689_v10  ;;  %v1134_v33 = vsel %vm1923_vm5, %v1609_v22, %v1133_v5  ;;  %v696_v16 = vsel %vm1911_vm4, %v694_v42, %v695_v46  ;;  %v805_v3 = vrot.slane %v2330_v38, 6 }
  0x72   : > { %v1470_v10 = vcombine.low %v355_v15, %v358_v28  ;;  %v1142_v13 = vrot.slane %v1140_v27, 4  ;;  %v808_v19 = vrot.slane %v1512_v54, 6 }
  0x73   : > { %731 = vrot.lane.b32.xlu1 %v1534_v23, %s1803_s24  ;;  %v1135_v23 = vrot.slane %v1133_v5, 4  ;;  %v1578_v5 = vld [vmem:[%s1901_s11 + $0x8c] sm:$0x3] }
  0x74   : > { %393 = vrot.lane.b32.xlu0 %v1468_v31, %s1802_s14  ;;  %v470_v31 = vrot.slane %v233_v18, 6  ;;  %v1143_v14 = vrot.slane %v1578_v5, 6  ;;  %v807_v18 = vrot.slane %v805_v3, 4  ;;  %v1030_v36 = vrot.slane %v1578_v5, 5 }
  0x75   : > { %v1137_v45 = vsel %vm1923_vm5, %v1135_v23, %v1136_v24 }
  0x76   : > { %v472_v43 = vrot.slane %v470_v31, 4  ;;  %v1617_v57 = vcombine.low %v1134_v33, %v1137_v45  ;;  %v809_v26 = vsel %vm1923_vm5, %v807_v18, %v808_v19 }
  0x77   : > { %945 = vrot.lane.b32.xlu1 %v1584_v40, %s1801_s13  ;;  %v802_v40 = vsel %vm1923_vm5, %v800_v21, %v801_v2  ;;  %v1027_v21 = vrot.slane %v1577_v34, 5 }
  0x78   : > { %610 = vrot.lane.b32.xlu0 %v1518_v44, %s1800_s12  ;;  %v1585_v44 = vcombine.low %v1573_v11, %v1574_v1  ;;  %v1551_v55 = vcombine.low %v799_v41, %v802_v40  ;;  %v693_v1 = vsel %vm1911_vm4, %v1528_v61, %v692_v48 }
  0x79   : > { %v1536_v9 = vcombine.low %v693_v1, %v696_v16  ;;  %v1029_v32 = vrot.slane %v1027_v21, 4 }
  0x7b   : > { %1179 = vrot.lane.b32.xlu1 %v1616_v59, %s1805_s27  ;;  %v474_v59 = vsel %vm1923_vm5, %v472_v43, %v473_v49  ;;  %v1031_v17 = vsel %vm1911_vm4, %v1029_v32, %v1030_v36  ;;  %v1287_v49 = vld [vmem:[%s2526_s2 + $0x8] sm:$0xff] }
  0x7c   : > { %844 = vrot.lane.b32.xlu0 %v1550_v58, %s1806_s28  ;;  %v471_v58 = vsel %vm1923_vm5, %v1478_v47, %v470_v31 }
  0x7d   : > { %v1486_v20 = vcombine.low %v471_v58, %v474_v59 }
  0x7f   : > { %511 = vrot.lane.b32.xlu1 %v1485_v4, %s1804_s25  ;;  %v1576_v4 = vld [vmem:[%s1901_s11 + $0x84] sm:$0xf] }
  0x80   : > { %1066 = vrot.lane.b32.xlu0 %v1600_v8, %s1807_s29  ;;  %v1544_v8 = vrot.slane %v2345_v37, 10  ;;  %v1610_v12 = vrot.slane %v1576_v4, 10  ;;  %v1586_v2 = vcombine.low %v1576_v4, %v1577_v34  ;;  %v1594_v31 = vrot.slane %v1576_v4, 9 }
  0x82   : > { %v806_v23 = vsel %vm1923_vm5, %v1544_v8, %v805_v3  ;;  %v1141_v24 = vsel %vm1923_vm5, %v1610_v12, %v1140_v27  ;;  %v1028_v35 = vsel %vm1911_vm4, %v1594_v31, %v1027_v21 }
  0x83   : > { %733 = vrot.lane.b32.xlu1 %v1535_v6, %s1803_s24  ;;  %v1520_v6 = vcombine.low %v2345_v37, %v2330_v38  ;;  %v1552_v41 = vcombine.low %v806_v23, %v809_v26  ;;  %v1602_v33 = vcombine.low %v1028_v35, %v1031_v17  ;;  %v1286_v37 = vld [vmem:[%s2526_s2] sm:$0xff] }
  0x84   : > { %395 = vrot.lane.b32.xlu0 %v1469_v25, %s1802_s14  ;;  %v1144_v25 = vsel %vm1923_vm5, %v1142_v13, %v1143_v14 }
  0x85   : > { %v1618_v38 = vcombine.low %v1141_v24, %v1144_v25 }
  0x87   : > { %947 = vrot.lane.b32.xlu1 %v1585_v44, %s1801_s13 }
  0x88   : > { %612 = vrot.lane.b32.xlu0 %v1519_v39, %s1800_s12 }
  0x8b   : > { %1181 = vrot.lane.b32.xlu1 %v1617_v57, %s1805_s27 }
  0x8c   : > { %846 = vrot.lane.b32.xlu0 %v1551_v55, %s1806_s28 }
  0x8f   : > { %513 = vrot.lane.b32.xlu1 %v1486_v20, %s1804_s25 }
  0x90   : > { %1068 = vrot.lane.b32.xlu0 %v1601_v30, %s1807_s29  ;;  %v601_v11 = vpop.permute.xlu1 %600 }
  0x93   : > { %735 = vrot.lane.b32.xlu1 %v1536_v9, %s1803_s24  ;;  %s198_s24 = sand.u32 1, %s1774_s15   ;;  %s1622_s15 = sshll.u32 (%p1882_p5), %s1786_s18, 2 }
  0x94   : > { %397 = vrot.lane.b32.xlu0 %v1470_v10, %s1802_s14  ;;  %v936_v22 = vpop.permute.xlu1 %935  ;;  %s1442_s25 = sshll.u32 %s198_s24, 4 }
  0x96   : > { %v384_v39 = vpop.permute.xlu0 %383 }
  0x97   : > { %408 = vst.msk [vmem:[#allocation2] sm:$0xff] %vm407_vm7, %v384_v39  ;;  %949 = vrot.lane.b32.xlu1 %v1586_v2, %s1801_s13 }
  0x98   : > { %614 = vrot.lane.b32.xlu0 %v1520_v6, %s1800_s12 }
  0x99   : > { %v722_v44 = vpop.permute.xlu1 %721 }
  0x9a   : > { %v500_v40 = vpop.permute.xlu0 %499 }
  0x9b   : > { %524 = vst.msk [vmem:[#allocation2] sm:$0xff] %vm523_vm8, %v500_v40  ;;  %1183 = vrot.lane.b32.xlu1 %v1618_v38, %s1805_s27  ;;  %s200_s27 = scalar_lea.vmem [#allocation3], %s1442_s25 }
  0x9c   : > { %848 = vrot.lane.b32.xlu0 %v1552_v41, %s1806_s28  ;;  %625 = vst.msk [vmem:[#allocation2] sm:$0xff] %vm624_vm9, %v601_v11  ;;  %s1324_s28 = sadd.s32 (%p1882_p5), %s1782_s17, %s1622_s15 }
  0x9d   : > { %746 = vst.msk [vmem:[#allocation2] sm:$0xff] %vm745_vm10, %v722_v44  ;;  %v1170_v45 = vpop.permute.xlu1 %1169 }
  0x9e   : > { %v835_v47 = vpop.permute.xlu0 %834 }
  0x9f   : > { %859 = vst.msk [vmem:[#allocation2] sm:$0xff] %vm858_vm11, %v835_v47  ;;  %1295 = vperm.xlu1 %1725, %v1287_v49  }
  0xa0   : > { %1070 = vrot.lane.b32.xlu0 %v1602_v33, %s1807_s29  ;;  %960 = vst.msk [vmem:[#allocation2] sm:$0xff] %vm959_vm12, %v936_v22  ;;  %s1623_s29 = sshll.u32 (%p1882_p5), %s1324_s28, 3 }
  0xa1   : > { %v502_v7 = vpop.permute.xlu1 %501  ;;  %s1326_s7 = scalar_lea.vmem (%p1882_p5), %s2528_s4, %s1623_s29 }
  0xa2   : > { %v1057_v43 = vpop.permute.xlu0 %1056 }
  0xa3   : > { %1081 = vst.msk [vmem:[#allocation2] sm:$0xff] %vm1080_vm14, %v1057_v43  ;;  %1304 = vperm.xlu1 %1725, %v1300_v52  }
  0xa4   : > { %1194 = vst.msk [vmem:[#allocation2] sm:$0xff] %vm1193_vm15, %v1170_v45  ;;  %1290 = vperm.xlu0 %1724, %v1286_v37  }
  0xa5   : > { %v724_v48 = vpop.permute.xlu1 %723 }
  0xa6   : > { %v386_v51 = vpop.permute.xlu0 %385 }
  0xa7   : > { %409 = vst.msk [vmem:[#allocation2 + $0x8] sm:$0xff] %vm407_vm7, %v386_v51 }
  0xa8   : > { %525 = vst.msk [vmem:[#allocation2 + $0x8] sm:$0xff] %vm523_vm8, %v502_v7  ;;  %1309 = vperm.xlu0 %1724, %v1301_v53  }
  0xa9   : > { %v938_v54 = vpop.permute.xlu1 %937 }
  0xaa   : > { %v603_v55 = vpop.permute.xlu0 %602 }
  0xab   : > { %626 = vst.msk [vmem:[#allocation2 + $0x8] sm:$0xff] %vm624_vm9, %v603_v55  ;;  %v1204_v56 = vld [vmem:[#allocation2] sm:$0xff] }
  0xac   : > { %747 = vst.msk [vmem:[#allocation2 + $0x8] sm:$0xff] %vm745_vm10, %v724_v48  ;;  %v1222_v57 = vsel %vm1217_vm0, %v1204_v56, 0 }
  0xad   : > { %1637 = vmatpush3.bf16.xpose.msra.mxu0 %v1222_v57  ;;  %v1172_v58 = vpop.permute.xlu1 %1171 }
  0xae   : > { %v837_v59 = vpop.permute.xlu0 %836  ;;  %1638 = vmatprep.subr.bf16.mxu0 %v1808_v60 }
  0xaf   : > { %860 = vst.msk [vmem:[#allocation2 + $0x8] sm:$0xff] %vm858_vm11, %v837_v59 }
  0xb0   : > { %961 = vst.msk [vmem:[#allocation2 + $0x8] sm:$0xff] %vm959_vm12, %v938_v54 }
  0xb1   : > { %v504_v61 = vpop.permute.xlu1 %503 }
  0xb2   : > { %v1059_v42 = vpop.permute.xlu0 %1058 }
  0xb3   : > { %1082 = vst.msk [vmem:[#allocation2 + $0x8] sm:$0xff] %vm1080_vm14, %v1059_v42 }
  0xb4   : > { %1195 = vst.msk [vmem:[#allocation2 + $0x8] sm:$0xff] %vm1193_vm15, %v1172_v58 }
  0xb5   : > { %v726_v46 = vpop.permute.xlu1 %725 }
  0xb6   : > { %v388_v62 = vpop.permute.xlu0 %387 }
  0xb7   : > { %410 = vst.msk [vmem:[#allocation2 + $0x10] sm:$0xff] %vm407_vm7, %v388_v62 }
  0xb8   : > { %526 = vst.msk [vmem:[#allocation2 + $0x10] sm:$0xff] %vm523_vm8, %v504_v61  ;;  %v1743_v61 = vld [vmem:[%s2525_s1] sm:$0xff]  }
  0xb9   : > { %v940_v63 = vpop.permute.xlu1 %939 }
  0xba   : > { %v605_v0 = vpop.permute.xlu0 %604 }
  0xbb   : > { %627 = vst.msk [vmem:[#allocation2 + $0x10] sm:$0xff] %vm624_vm9, %v605_v0  ;;  %v1205_v29 = vld [vmem:[#allocation2 + $0x8] sm:$0xff] }
  0xbc   : > { %748 = vst.msk [vmem:[#allocation2 + $0x10] sm:$0xff] %vm745_vm10, %v726_v46  ;;  %v1225_v34 = vsel %vm1217_vm0, %v1205_v29, 0 }
  0xbd   : > { %1639 = vmatpush3.bf16.xpose.msra.mxu0 %v1225_v34  ;;  %v1174_v20 = vpop.permute.xlu1 %1173 }
  0xbe   : > { %v839_v30 = vpop.permute.xlu0 %838  ;;  %1640 = vmatprep.subr.bf16.mxu0 %v1808_v60 }
  0xbf   : > { %861 = vst.msk [vmem:[#allocation2 + $0x10] sm:$0xff] %vm858_vm11, %v839_v30 }
  0xc0   : > { %962 = vst.msk [vmem:[#allocation2 + $0x10] sm:$0xff] %vm959_vm12, %v940_v63 }
  0xc1   : > { %v506_v1 = vpop.permute.xlu1 %505 }
  0xc2   : > { %v1061_v16 = vpop.permute.xlu0 %1060 }
  0xc3   : > { %1083 = vst.msk [vmem:[#allocation2 + $0x10] sm:$0xff] %vm1080_vm14, %v1061_v16 }
  0xc4   : > { %1196 = vst.msk [vmem:[#allocation2 + $0x10] sm:$0xff] %vm1193_vm15, %v1174_v20 }
  0xc5   : > { %v728_v27 = vpop.permute.xlu1 %727 }
  0xc6   : > { %v390_v15 = vpop.permute.xlu0 %389 }
  0xc7   : > { %411 = vst.msk [vmem:[#allocation2 + $0x18] sm:$0xff] %vm407_vm7, %v390_v15 }
  0xc8   : > { %527 = vst.msk [vmem:[#allocation2 + $0x18] sm:$0xff] %vm523_vm8, %v506_v1 }
  0xc9   : > { %v942_v28 = vpop.permute.xlu1 %941 }
  0xca   : > { %v607_v3 = vpop.permute.xlu0 %606 }
  0xcb   : > { %628 = vst.msk [vmem:[#allocation2 + $0x18] sm:$0xff] %vm624_vm9, %v607_v3  ;;  %v1206_v4 = vld [vmem:[#allocation2 + $0x10] sm:$0xff] }
  0xcc   : > { %749 = vst.msk [vmem:[#allocation2 + $0x18] sm:$0xff] %vm745_vm10, %v728_v27  ;;  %v1228_v5 = vsel %vm1217_vm0, %v1206_v4, 0 }
  0xcd   : > { %1641 = vmatpush3.bf16.xpose.msra.mxu0 %v1228_v5  ;;  %v1176_v8 = vpop.permute.xlu1 %1175 }
  0xce   : > { %v841_v9 = vpop.permute.xlu0 %840  ;;  %1642 = vmatprep.subr.bf16.mxu0 %v1808_v60 }
  0xcf   : > { %862 = vst.msk [vmem:[#allocation2 + $0x18] sm:$0xff] %vm858_vm11, %v841_v9 }
  0xd0   : > { %963 = vst.msk [vmem:[#allocation2 + $0x18] sm:$0xff] %vm959_vm12, %v942_v28 }
  0xd1   : > { %v508_v10 = vpop.permute.xlu1 %507 }
  0xd2   : > { %v1063_v11 = vpop.permute.xlu0 %1062 }
  0xd3   : > { %1084 = vst.msk [vmem:[#allocation2 + $0x18] sm:$0xff] %vm1080_vm14, %v1063_v11 }
  0xd4   : > { %1197 = vst.msk [vmem:[#allocation2 + $0x18] sm:$0xff] %vm1193_vm15, %v1176_v8 }
  0xd5   : > { %v730_v12 = vpop.permute.xlu1 %729 }
  0xd6   : > { %v392_v13 = vpop.permute.xlu0 %391 }
  0xd7   : > { %412 = vst.msk [vmem:[#allocation2 + $0x20] sm:$0xff] %vm407_vm7, %v392_v13 }
  0xd8   : > { %528 = vst.msk [vmem:[#allocation2 + $0x20] sm:$0xff] %vm523_vm8, %v508_v10 }
  0xd9   : > { %v944_v14 = vpop.permute.xlu1 %943 }
  0xda   : > { %v609_v18 = vpop.permute.xlu0 %608 }
  0xdb   : > { %629 = vst.msk [vmem:[#allocation2 + $0x20] sm:$0xff] %vm624_vm9, %v609_v18  ;;  %v1207_v19 = vld [vmem:[#allocation2 + $0x18] sm:$0xff] }
  0xdc   : > { %750 = vst.msk [vmem:[#allocation2 + $0x20] sm:$0xff] %vm745_vm10, %v730_v12  ;;  %v1231_v21 = vsel %vm1217_vm0, %v1207_v19, 0 }
  0xdd   : > { %1643 = vmatpush3.bf16.xpose.msra.mxu0 %v1231_v21  ;;  %v1178_v2 = vpop.permute.xlu1 %1177 }
  0xde   : > { %v843_v6 = vpop.permute.xlu0 %842  ;;  %1644 = vmatprep.subr.bf16.mxu0 %v1808_v60 }
  0xdf   : > { %863 = vst.msk [vmem:[#allocation2 + $0x20] sm:$0xff] %vm858_vm11, %v843_v6 }
  0xe0   : > { %964 = vst.msk [vmem:[#allocation2 + $0x20] sm:$0xff] %vm959_vm12, %v944_v14 }
  0xe1   : > { %v510_v22 = vpop.permute.xlu1 %509 }
  0xe2   : > { %v1065_v23 = vpop.permute.xlu0 %1064 }
  0xe3   : > { %1085 = vst.msk [vmem:[#allocation2 + $0x20] sm:$0xff] %vm1080_vm14, %v1065_v23 }
  0xe4   : > { %1198 = vst.msk [vmem:[#allocation2 + $0x20] sm:$0xff] %vm1193_vm15, %v1178_v2 }
  0xe5   : > { %v732_v24 = vpop.permute.xlu1 %731 }
  0xe6   : > { %v394_v25 = vpop.permute.xlu0 %393 }
  0xe7   : > { %413 = vst.msk [vmem:[#allocation2 + $0x28] sm:$0xff] %vm407_vm7, %v394_v25 }
  0xe8   : > { %529 = vst.msk [vmem:[#allocation2 + $0x28] sm:$0xff] %vm523_vm8, %v510_v22 }
  0xe9   : > { %v946_v26 = vpop.permute.xlu1 %945 }
  0xea   : > { %v611_v31 = vpop.permute.xlu0 %610 }
  0xeb   : > { %630 = vst.msk [vmem:[#allocation2 + $0x28] sm:$0xff] %vm624_vm9, %v611_v31  ;;  %v1208_v32 = vld [vmem:[#allocation2 + $0x20] sm:$0xff] }
  0xec   : > { %751 = vst.msk [vmem:[#allocation2 + $0x28] sm:$0xff] %vm745_vm10, %v732_v24  ;;  %v1234_v36 = vsel %vm1217_vm0, %v1208_v32, 0 }
  0xed   : > { %1645 = vmatpush3.bf16.xpose.msra.mxu0 %v1234_v36  ;;  %v1180_v39 = vpop.permute.xlu1 %1179 }
  0xee   : > { %v845_v38 = vpop.permute.xlu0 %844  ;;  %1646 = vmatprep.subr.bf16.mxu0 %v1808_v60 }
  0xef   : > { %864 = vst.msk [vmem:[#allocation2 + $0x28] sm:$0xff] %vm858_vm11, %v845_v38 }
  0xf0   : > { %965 = vst.msk [vmem:[#allocation2 + $0x28] sm:$0xff] %vm959_vm12, %v946_v26 }
  0xf1   : > { %v512_v41 = vpop.permute.xlu1 %511 }
  0xf2   : > { %v1067_v44 = vpop.permute.xlu0 %1066 }
  0xf3   : > { %1086 = vst.msk [vmem:[#allocation2 + $0x28] sm:$0xff] %vm1080_vm14, %v1067_v44 }
  0xf4   : > { %1199 = vst.msk [vmem:[#allocation2 + $0x28] sm:$0xff] %vm1193_vm15, %v1180_v39 }
  0xf5   : > { %v734_v35 = vpop.permute.xlu1 %733 }
  0xf6   : > { %v396_v17 = vpop.permute.xlu0 %395 }
  0xf7   : > { %414 = vst.msk [vmem:[#allocation2 + $0x30] sm:$0xff] %vm407_vm7, %v396_v17 }
  0xf8   : > { %530 = vst.msk [vmem:[#allocation2 + $0x30] sm:$0xff] %vm523_vm8, %v512_v41 }
  0xf9   : > { %v948_v40 = vpop.permute.xlu1 %947 }
  0xfa   : > { %v613_v33 = vpop.permute.xlu0 %612 }
  0xfb   : > { %631 = vst.msk [vmem:[#allocation2 + $0x30] sm:$0xff] %vm624_vm9, %v613_v33  ;;  %v1209_v45 = vld [vmem:[#allocation2 + $0x28] sm:$0xff] }
  0xfc   : > { %752 = vst.msk [vmem:[#allocation2 + $0x30] sm:$0xff] %vm745_vm10, %v734_v35  ;;  %v1237_v47 = vsel %vm1217_vm0, %v1209_v45, 0 }
  0xfd   : > { %1647 = vmatpush3.bf16.xpose.msra.mxu0 %v1237_v47  ;;  %v1182_v7 = vpop.permute.xlu1 %1181 }
  0xfe   : > { %v847_v43 = vpop.permute.xlu0 %846  ;;  %1648 = vmatprep.subr.bf16.mxu0 %v1808_v60 }
  0xff   : > { %865 = vst.msk [vmem:[#allocation2 + $0x30] sm:$0xff] %vm858_vm11, %v847_v43 }
 0x100   : > { %966 = vst.msk [vmem:[#allocation2 + $0x30] sm:$0xff] %vm959_vm12, %v948_v40 }
 0x101   : > { %v514_v49 = vpop.permute.xlu1 %513 }
 0x102   : > { %v1069_v37 = vpop.permute.xlu0 %1068 }
 0x103   : > { %1087 = vst.msk [vmem:[#allocation2 + $0x30] sm:$0xff] %vm1080_vm14, %v1069_v37 }
 0x104   : > { %1200 = vst.msk [vmem:[#allocation2 + $0x30] sm:$0xff] %vm1193_vm15, %v1182_v7 }
 0x105   : > { %v736_v48 = vpop.permute.xlu1 %735 }
 0x106   : > { %v398_v50 = vpop.permute.xlu0 %397 }
 0x107   : > { %415 = vst.msk [vmem:[#allocation2 + $0x38] sm:$0xff] %vm407_vm7, %v398_v50 }
 0x108   : > { %531 = vst.msk [vmem:[#allocation2 + $0x38] sm:$0xff] %vm523_vm8, %v514_v49 }
 0x109   : > { %v950_v53 = vpop.permute.xlu1 %949 }
 0x10a   : > { %v615_v51 = vpop.permute.xlu0 %614 }
 0x10b   : > { %632 = vst.msk [vmem:[#allocation2 + $0x38] sm:$0xff] %vm624_vm9, %v615_v51  ;;  %v1210_v52 = vld [vmem:[#allocation2 + $0x30] sm:$0xff] }
 0x10c   : > { %753 = vst.msk [vmem:[#allocation2 + $0x38] sm:$0xff] %vm745_vm10, %v736_v48  ;;  %v1240_v54 = vsel %vm1217_vm0, %v1210_v52, 0 }
 0x10d   : > { %1649 = vmatpush3.bf16.xpose.msra.mxu0 %v1240_v54  ;;  %v1184_v56 = vpop.permute.xlu1 %1183 }
 0x10e   : > { %v849_v55 = vpop.permute.xlu0 %848  ;;  %1650 = vmatprep.subr.bf16.mxu0 %v1808_v60 }
 0x10f   : > { %866 = vst.msk [vmem:[#allocation2 + $0x38] sm:$0xff] %vm858_vm11, %v849_v55 }
 0x110   : > { %967 = vst.msk [vmem:[#allocation2 + $0x38] sm:$0xff] %vm959_vm12, %v950_v53 }
 0x112   : > { %v1071_v57 = vpop.permute.xlu0 %1070 }
 0x113   : > { %1088 = vst.msk [vmem:[#allocation2 + $0x38] sm:$0xff] %vm1080_vm14, %v1071_v57 }
 0x114   : > { %1201 = vst.msk [vmem:[#allocation2 + $0x38] sm:$0xff] %vm1193_vm15, %v1184_v56 }
 0x11b   : > { %v1211_v58 = vld [vmem:[#allocation2 + $0x38] sm:$0xff] }
 0x11c   : > { %v1243_v59 = vsel %vm1217_vm0, %v1211_v58, 0 }
 0x11d   : > { %1651 = vmatpush3.bf16.xpose.msra.mxu0 %v1243_v59 }
 0x11e   : > { %v1296_v60 = vpop.permute.xlu1 %1295 }
 0x122   : > { %v1305_v0 = vpop.permute.xlu1 %1304 }
 0x123   : > { %v1291_v42 = vpop.permute.xlu0 %1290 }
 0x124   : > { %1653 = vmatmul.mubr.msk.bf16.vlgmr.msra.gmra.mrb[0].mxu0 %vm1217_vm0, %v1743_v61 }
 0x127   : > { %v1310_v1 = vpop.permute.xlu0 %1309 }
 0x1f7   : > { %v1279_v46 = vpop.f32.mrb[0].mxu0 }
 0x1f8   : > { %v1298_v62 = vmul.f32 %v1291_v42, %v1279_v46  ;;  %v1654_v63 = vpop.f32.mrb[1].mxu0  ;;  %1322 = sbr.rel (!%p1882_p5) target bundleno = 519 (0x207), region = 40 }
 0x1f9   : > { %v1282_v29 = vpop.f32.mrb[2].mxu0 }
 0x1fa   : > { %v1312_v34 = vadd.f32 %v1305_v0, %v1298_v62  ;;  %v1299_v20 = vmul.f32 %v1296_v60, %v1282_v29  ;;  %v1655_v30 = vpop.f32.mrb[3].mxu0 }
 0x1fc   : > { %1314 = vst [vmem:[%s200_s27] sm:$0xff] %v1312_v34  ;;  %v1313_v16 = vadd.f32 %v1310_v1, %v1299_v20 }
 0x1fe   : > { %1315 = vst [vmem:[%s200_s27 + $0x8] sm:$0xff] %v1313_v16 }
 0x203   : > { %v1356_v27 = vld [vmem:[%s200_s27] sm:$0xff] }
 0x204   : > { %1357 = vst [vmem:[%s1326_s7] sm:$0xff] %v1356_v27 }
 0x205   : > { %v1358_v15 = vld [vmem:[%s200_s27 + $0x8] sm:$0xff] }
 0x206   : > { %1359 = vst [vmem:[%s1326_s7 + $0x10] sm:$0xff] %v1358_v15 }
 0x207 PF: > { %s14_s21 = sadd.s32 1, %s1798_s21   ;;  %s2534_s15 = smov %s1778_s16 }
 0x208   : > { %p11_p10 = scmp.ge.s32.totalorder %s14_s21, 10   ;;  %s2535_s16 = smov %s1893_s30 }
 0x209   : > { %s2536_s17 = smov %s1790_s19  ;;  %s2537_s18 = smov %s1794_s20 }
 0x20a   : > { %s2538_s19 = smov %s2541_s22  ;;  %s2539_s20 = smov %s2545_s23 }
 0x20b   :  { %13 = sbr.rel (!%p11_p10) target bundleno = 4 (0x4), region = 107 }

</bundles_post_ra>
